<compile_context>
chip_gen: v7x
topology: tpu7x:2x2x1
jax: 0.10.0
libtpu: 0.0.40
codegen_flags: <defaults>
</compile_context>

<pallas_src>
import functools

import jax
import jax.numpy as jnp
from jax.experimental import pallas as pl
from jax.experimental.pallas import tpu as pltpu

LANE = 128
SUBLANE = 8


def _round_up(x, m):
    return (x + m - 1) // m * m


def _largest_divisor_tile(n_pad, base_tile, cap):
    """Largest multiple of `base_tile` that divides `n_pad` and is <= cap."""
    n_tiles = n_pad // base_tile
    best = 1
    for d in range(1, n_tiles + 1):
        if n_tiles % d == 0 and d * base_tile <= cap:
            best = d
    return best * base_tile


# --------------------------------------------------------------------------
# Kernel 1: feature transform   XW1 = X @ W1   (row-tiled over node rows)
# --------------------------------------------------------------------------
def _transform_kernel(x_ref, w_ref, o_ref):
    # bf16 x bf16 -> f32 accumulation on the MXU; store bf16.
    o_ref[...] = jnp.dot(
        x_ref[...], w_ref[...], preferred_element_type=jnp.float32
    ).astype(o_ref.dtype)


def feature_transform(x, w, *, tm, out_dtype, vmem_limit):
    n, k = x.shape
    f = w.shape[1]
    return pl.pallas_call(
        _transform_kernel,
        out_shape=jax.ShapeDtypeStruct((n, f), out_dtype),
        grid=(n // tm,),
        in_specs=[
            pl.BlockSpec((tm, k), lambda i: (i, 0)),   # streamed X row tiles
            pl.BlockSpec((k, f), lambda i: (0, 0)),    # weights: constant index -> DMA'd once
        ],
        out_specs=pl.BlockSpec((tm, f), lambda i: (i, 0)),
        compiler_params=pltpu.CompilerParams(
            dimension_semantics=("parallel",),
            vmem_limit_bytes=vmem_limit,
        ),
    )(x, w)


# --------------------------------------------------------------------------
# Kernel 2: fused two-layer aggregation with VMEM-resident A_hat
#   grid = (2, n_row_tiles)
#   phase 0:  HW2[rows(i)] = relu(A[rows(i), :] @ XW1 + b1) @ W2   (VMEM scratch)
#   phase 1:  OUT[rows(i)] = A[rows(i), :] @ HW2 + b2
# --------------------------------------------------------------------------
def _fused_gcn_kernel(a_ref, xw1_ref, w2_ref, b1_ref, b2_ref, o_ref, hw2_ref, *, tm):
    phase = pl.program_id(0)
    i = pl.program_id(1)
    row0 = pl.multiple_of(i * tm, tm)
    a_tile = a_ref[pl.ds(row0, tm), :]          # (tm, n_pad) bf16, sliced from resident A

    @pl.when(phase == 0)
    def _():
        h = jnp.dot(a_tile, xw1_ref[...], preferred_element_type=jnp.float32)
        h = jnp.maximum(h + b1_ref[...], 0.0)
        hw2 = jnp.dot(
            h.astype(w2_ref.dtype), w2_ref[...], preferred_element_type=jnp.float32
        )
        hw2_ref[pl.ds(row0, tm), :] = hw2.astype(hw2_ref.dtype)
        # Output block is revisited (and fully overwritten) in phase 1; write
        # zeros here so the interim HBM contents are deterministic.
        o_ref[...] = jnp.zeros_like(o_ref)

    @pl.when(phase == 1)
    def _():
        out = jnp.dot(a_tile, hw2_ref[...], preferred_element_type=jnp.float32)
        o_ref[...] = (out + b2_ref[...]).astype(o_ref.dtype)


def aggregate_fused(a_hat_p, xw1, w2_p, b1_p, b2_p, *, tm, out_dtype, vmem_limit):
    n_pad = a_hat_p.shape[0]
    h_pad = xw1.shape[1]
    c_pad = w2_p.shape[1]
    kernel = functools.partial(_fused_gcn_kernel, tm=tm)
    return pl.pallas_call(
        kernel,
        out_shape=jax.ShapeDtypeStruct((n_pad, c_pad), out_dtype),
        grid=(2, n_pad // tm),
        in_specs=[
            pl.BlockSpec((n_pad, n_pad), lambda p, i: (0, 0)),  # A_hat: resident, read once
            pl.BlockSpec((n_pad, h_pad), lambda p, i: (0, 0)),  # XW1: resident
            pl.BlockSpec((h_pad, c_pad), lambda p, i: (0, 0)),  # W2: resident
            pl.BlockSpec((1, h_pad), lambda p, i: (0, 0)),      # b1
            pl.BlockSpec((1, c_pad), lambda p, i: (0, 0)),      # b2
        ],
        out_specs=pl.BlockSpec((tm, c_pad), lambda p, i: (i, 0)),
        scratch_shapes=[pltpu.VMEM((n_pad, c_pad), jnp.bfloat16)],  # HW2 stays on-chip
        compiler_params=pltpu.CompilerParams(
            # Phase axis is a true dependence and phase 1 reads HW2 rows produced
            # by every phase-0 row tile, so the row axis must stay sequential too
            # (no megacore sharding of this kernel's grid).
            dimension_semantics=("arbitrary", "arbitrary"),
            vmem_limit_bytes=vmem_limit,
        ),
    )(a_hat_p, xw1, w2_p, b1_p, b2_p)


# --------------------------------------------------------------------------
# Full 2-layer GCN forward
# --------------------------------------------------------------------------
def gcn_forward(a_hat, x, w1, b1, w2, b2, *, tm=256, tm_transform_cap=1024,
                vmem_limit=32 * 1024 * 1024):
    n, f_in = x.shape
    h_dim = w1.shape[1]
    c_dim = w2.shape[1]

    # Aggregation row tile: multiple of 8 sublanes, no larger than the node count;
    # n is padded so that tm divides it exactly.
    tm = _round_up(min(tm, n), SUBLANE)
    n_pad = _round_up(n, tm)
    # Transform kernel streams only X row tiles, so it can afford a larger tile.
    tm_x = _largest_divisor_tile(n_pad, tm, tm_transform_cap)

    f_in_pad = _round_up(f_in, LANE)   # lane-dense K (e.g. 1433 -> 1536)
    h_pad = _round_up(h_dim, LANE)     # 10 -> 128: lane-dense stores, full MXU width
    c_pad = _round_up(c_dim, LANE)     # 7  -> 128

    # Zero-pad to TPU-friendly shapes; all matmul operands in bf16, biases in f32.
    a_p = jnp.zeros((n_pad, n_pad), jnp.bfloat16).at[:n, :n].set(
        a_hat.astype(jnp.bfloat16))
    x_p = jnp.zeros((n_pad, f_in_pad), jnp.bfloat16).at[:n, :f_in].set(
        x.astype(jnp.bfloat16))
    w1_p = jnp.zeros((f_in_pad, h_pad), jnp.bfloat16).at[:f_in, :h_dim].set(
        w1.astype(jnp.bfloat16))
    w2_p = jnp.zeros((h_pad, c_pad), jnp.bfloat16).at[:h_dim, :c_dim].set(
        w2.astype(jnp.bfloat16))
    b1_p = jnp.zeros((1, h_pad), jnp.float32).at[:, :h_dim].set(b1)
    b2_p = jnp.zeros((1, c_pad), jnp.float32).at[:, :c_dim].set(b2)

    # Kernel 1: XW1 = X @ W1 (row-tiled, bf16, megacore parallel).
    xw1 = feature_transform(x_p, w1_p, tm=tm_x, out_dtype=jnp.bfloat16,
                            vmem_limit=vmem_limit)

    # Kernel 2: both GCN aggregations fused; A_hat read from HBM exactly once.
    out = aggregate_fused(a_p, xw1, w2_p, b1_p, b2_p, tm=tm,
                          out_dtype=jnp.float32, vmem_limit=vmem_limit)

    return out[:n, :c_dim]


# --------------------------------------------------------------------------
# Glue: dense symmetrically-normalized adjacency (PyG gcn_norm semantics)
# --------------------------------------------------------------------------
def build_normalized_adjacency(edge_index, num_nodes):
    """Dense D^-1/2 (A + I) D^-1/2 with add_remaining_self_loops semantics."""
    # TODO(synk): for graphs much larger than Cora, switch to a sparse CSR/gather
    # aggregation (scalar-prefetched row offsets + neighbor indices) instead of a
    # dense A_hat.
    src, dst = edge_index[0], edge_index[1]
    a = jnp.zeros((num_nodes, num_nodes), jnp.float32)
    a = a.at[dst, src].set(1.0)                                 # message j -> i at A[i, j]
    a = jnp.maximum(a, jnp.eye(num_nodes, dtype=jnp.float32))   # add *remaining* self-loops
    deg = jnp.sum(a, axis=1)
    dinv = jnp.where(deg > 0, 1.0 / jnp.sqrt(deg), 0.0)
    return dinv[:, None] * a * dinv[None, :]


def glorot(key, shape):
    fan_in, fan_out = shape
    limit = jnp.sqrt(6.0 / (fan_in + fan_out))
    return jax.random.uniform(key, shape, jnp.float32, -limit, limit)


if __name__ == "__main__":
    # Small synthetic "Cora-like" setup (real Cora: 2708 nodes, 1433 feats, 7 classes)
    num_nodes = 64
    input_dim = 16
    hidden_dim = 10
    output_dim = 7
    num_edges = 256

    key = jax.random.PRNGKey(0)
    k_x, k_src, k_dst, k_w1, k_b1, k_w2, k_b2 = jax.random.split(key, 7)

    x = jax.random.normal(k_x, (num_nodes, input_dim), jnp.float32)
    edge_index = jnp.stack(
        [
            jax.random.randint(k_src, (num_edges,), 0, num_nodes),
            jax.random.randint(k_dst, (num_edges,), 0, num_nodes),
        ],
        axis=0,
    )

    w1 = glorot(k_w1, (input_dim, hidden_dim))
    b1 = 0.01 * jax.random.normal(k_b1, (1, hidden_dim), jnp.float32)
    w2 = glorot(k_w2, (hidden_dim, output_dim))
    b2 = 0.01 * jax.random.normal(k_b2, (1, output_dim), jnp.float32)

    a_hat = build_normalized_adjacency(edge_index, num_nodes)

    # tm=32 -> n_pad=64, fused aggregation grid=(2, 2): exercises the phase axis
    # and the row tiling even at this tiny test size.
    out = gcn_forward(a_hat, x, w1, b1, w2, b2, tm=32)
    out = jax.block_until_ready(out)

    # Pure-f32 reference (kernels use bf16 operands with f32 accumulation,
    # so compare with a modest tolerance).
    h_ref = jnp.maximum(a_hat @ (x @ w1) + b1, 0.0)
    out_ref = a_hat @ (h_ref @ w2) + b2
    assert out.shape == (num_nodes, output_dim)
    assert jnp.allclose(out, out_ref, atol=5e-2, rtol=5e-2), (
        float(jnp.max(jnp.abs(out - out_ref)))
    )

    print("KERNEL_OK")
</pallas_src>

<mosaic_0001>
module attributes {stable_mosaic.version = 11 : i64} {
  func.func @_transform_kernel(%arg0: i32, %arg1: memref<64x128xbf16, #tpu.memory_space<vmem>>, %arg2: memref<128x128xbf16, #tpu.memory_space<vmem>>, %arg3: memref<64x128xbf16, #tpu.memory_space<vmem>>) attributes {dimension_semantics = [#tpu.dimension_semantics<parallel>], iteration_bounds = array<i64: 1>, scalar_prefetch = 0 : i64, scratch_operands = 0 : i64, tpu.core_type = #tpu.core_type<tc>, window_params = [{transform_indices = @transform_0, window_bounds = array<i64: 64, 128>}, {pipeline_mode = #tpu.pipeline_mode<synchronous>, transform_indices = @transform_1, window_bounds = array<i64: 128, 128>}, {transform_indices = @transform_2, window_bounds = array<i64: 64, 128>}]} {
    %c0 = arith.constant 0 : index
    %c0_0 = arith.constant 0 : index
    %0 = vector.load %arg1[%c0, %c0_0] : memref<64x128xbf16, #tpu.memory_space<vmem>>, vector<64x128xbf16>
    %c0_1 = arith.constant 0 : index
    %c0_2 = arith.constant 0 : index
    %1 = vector.load %arg2[%c0_1, %c0_2] : memref<128x128xbf16, #tpu.memory_space<vmem>>, vector<128x128xbf16>
    %cst = arith.constant dense<0.000000e+00> : vector<64x128xf32>
    %2 = tpu.matmul %0, %1, %cst {dimension_numbers = #tpu.dot_dimension_numbers<[1], [0], [0], [1], [0, 0, 1, 1], [], []>} : vector<64x128xbf16>, vector<128x128xbf16>, vector<64x128xf32> -> vector<64x128xf32>
    %3 = arith.truncf %2 : vector<64x128xf32> to vector<64x128xbf16>
    %c0_3 = arith.constant 0 : index
    %c0_4 = arith.constant 0 : index
    %4 = vector.load %arg3[%c0_3, %c0_4] : memref<64x128xbf16, #tpu.memory_space<vmem>>, vector<64x128xbf16>
    tpu.vector_store %arg3[%c0_3, %c0_4], %3 {strides = array<i32>} : memref<64x128xbf16, #tpu.memory_space<vmem>>, vector<64x128xbf16>,
    return
  }
  func.func @transform_0(%arg0: i32) -> (i32, i32) {
    %c0_i32 = arith.constant 0 : i32
    %c0_i32_0 = arith.constant 0 : i32
    return %arg0, %c0_i32 : i32, i32
  }
  func.func @transform_1(%arg0: i32) -> (i32, i32) {
    %c0_i32 = arith.constant 0 : i32
    %c0_i32_0 = arith.constant 0 : i32
    %c0_i32_1 = arith.constant 0 : i32
    return %c0_i32, %c0_i32_0 : i32, i32
  }
  func.func @transform_2(%arg0: i32) -> (i32, i32) {
    %c0_i32 = arith.constant 0 : i32
    %c0_i32_0 = arith.constant 0 : i32
    return %arg0, %c0_i32 : i32, i32
  }
}

</mosaic_0001>

<bundles_post_ra>
// kernel: tpu_custom_call.1
= control target key start
LH: loop header
LB: loop body
LE: loop exit
PB: predicated region body
PF: predicated region fallthrough
CT: control target
= control target key end

     0   :  { %7 = vsyncpa [#allocation3], 0  ;;  %s517_s0 = inlined_call_operand.hbm [shape: bf16[64,128], index: 0, kind: input, shape index: {}]   ;;  %s518_s1 = inlined_call_operand.hbm [shape: bf16[128,128], index: 1, kind: input, shape index: {}]   ;;  %s519_s2 = inlined_call_operand.hbm [shape: bf16[64,128], index: 2, kind: output, shape index: {}]  }
   0x1   :  { %8 = vsyncpa [#allocation6], 0 }
   0x2   :  { %9 = vsyncpa [#allocation4], 0  ;;  %s452_s9 = smov [#allocation2]   ;;  %s380_s13 = scalar_lea.hbm %s517_s0, 512 }
   0x3   :  { %s15_s10 = sshll.u32 %s452_s9, 4  ;;  %p381_p0 = scmp.ne.s32.totalorder %s517_s0, %s380_s13  ;;  %s16_s10 = int_to_ptr.vmem [resolvable:$true] %s15_s10 }
   0x4   :  { %p384_p1 = scmp.lt.u32.totalorder %s380_s13, %s517_s0 }
   0x6   :  { %p386_p2 = pnand %p384_p1, %p381_p0 }
   0x8   :  { %389 = shalt.err (!%p386_p2)
}
   0x9   :  { %s390_s18 = scalar_lea.vmem %s16_s10, 512  ;;  %p395_p4 = scmp.lt.s32.totalorder %s16_s10, %s16_s10 }
   0xa   :  { %p391_p3 = scmp.ne.s32.totalorder %s16_s10, %s390_s18  ;;  %p396_p5 = scmp.lt.s32.totalorder %s390_s18, %s390_s18 }
   0xc   :  { %p397_p6 = por %p396_p5, %p395_p4 }
   0xe   :  { %p398_p7 = pnand %p397_p6, %p391_p3 }
  0x10   :  { %401 = shalt.err (!%p398_p7)
}
  0x11   :  { %s453_s19 = smov 64   ;;  %s454_s20 = smov 4  }
  0x12   :  { %21 = dma.hbm_to_vmem [thread:$0]  %s517_s0, 512, %s16_s10, [#allocation3], %s453_s19, %s453_s19, %s454_s20  }
  0x13   :  { %s455_s23 = smov [#allocation5]   ;;  %s402_s27 = scalar_lea.hbm %s518_s1, 1024 }
  0x14   :  { %s27_s24 = sshll.u32 %s455_s23, 4  ;;  %p403_p8 = scmp.ne.s32.totalorder %s518_s1, %s402_s27  ;;  %s28_s24 = int_to_ptr.vmem [resolvable:$true] %s27_s24 }
  0x15   :  { %p406_p9 = scmp.lt.u32.totalorder %s402_s27, %s518_s1 }
  0x17   :  { %p408_p10 = pnand %p406_p9, %p403_p8 }
  0x19   :  { %411 = shalt.err (!%p408_p10)
}
  0x1a   :  { %s412_s4 = scalar_lea.vmem %s28_s24, 1024  ;;  %p417_p12 = scmp.lt.s32.totalorder %s28_s24, %s28_s24 }
  0x1b   :  { %p413_p11 = scmp.ne.s32.totalorder %s28_s24, %s412_s4  ;;  %p418_p13 = scmp.lt.s32.totalorder %s412_s4, %s412_s4 }
  0x1d   :  { %p419_p0 = por %p418_p13, %p417_p12 }
  0x1f   :  { %p420_p1 = pnand %p419_p0, %p413_p11 }
  0x21   :  { %423 = shalt.err (!%p420_p1)
}
  0x22   :  { %33 = dma.hbm_to_vmem [thread:$0]  %s518_s1, 1024, %s28_s24, [#allocation6], %s453_s19, %s453_s19, %s454_s20  }
  0x23   :  { %446 = dma.done.wait [#allocation3], 512  }
  0x24   :  { %447 = vsyncadd [#allocation3], 4294966784 }
  0x25   :  { %448 = dma.done.wait [#allocation6], 1024  }
  0x26   :  { %449 = vsyncadd [#allocation6], 4294966272  ;;  %v368_v0 = vld [vmem:[#allocation5] sm:$0xff]   ;;  %v369_v1 = vld [vmem:[#allocation5 + $0x8] sm:$0xff]   ;;  %s456_s1 = smov [#allocation7]  }
  0x27   :  { %323 = vmatprep.subr.bf16.mxu0 %v368_v0  ;;  %347 = vmatprep.subr.bf16.mxu1 %v368_v0  ;;  %v370_v2 = vld [vmem:[#allocation5 + $0x10] sm:$0xff]   ;;  %v371_v3 = vld [vmem:[#allocation5 + $0x18] sm:$0xff]   ;;  %v376_v4 = vld [vmem:[#allocation2] sm:$0xff]   ;;  %s247_s6 = sshll.u32 %s456_s1, 4  ;;  %s248_s6 = int_to_ptr.vmem [resolvable:$true] %s247_s6 }
  0x28   :  { %324 = vmatpush3.bf16.msra.mxu0 %v368_v0  ;;  %355 = vmatpush3.bf16.msra.mxu1 %v368_v0  ;;  %v377_v5 = vld [vmem:[#allocation2 + $0x10] sm:$0xff]   ;;  %v372_v6 = vld [vmem:[#allocation5 + $0x20] sm:$0xff]   ;;  %v373_v7 = vld [vmem:[#allocation5 + $0x28] sm:$0xff]   ;;  %s424_s7 = scalar_lea.vmem %s248_s6, 512  ;;  %p429_p3 = scmp.lt.s32.totalorder %s248_s6, %s248_s6 }
  0x29   :  { %325 = vmatprep.subr.bf16.mxu0 %v369_v1  ;;  %348 = vmatprep.subr.bf16.mxu1 %v369_v1  ;;  %v374_v8 = vld [vmem:[#allocation5 + $0x30] sm:$0xff]   ;;  %v375_v9 = vld [vmem:[#allocation5 + $0x38] sm:$0xff]   ;;  %v378_v10 = vld [vmem:[#allocation2 + $0x8] sm:$0xff]   ;;  %p425_p2 = scmp.ne.s32.totalorder %s248_s6, %s424_s7  ;;  %p430_p4 = scmp.lt.s32.totalorder %s424_s7, %s424_s7 }
  0x2a   :  { %339 = vmatprep.mubr.bf16.mxu0 %v376_v4  ;;  %343 = vmatprep.mubr.bf16.mxu1 %v377_v5  ;;  %v379_v11 = vld [vmem:[#allocation2 + $0x18] sm:$0xff]  }
  0x2b   :  { %p431_p5 = por %p430_p4, %p429_p3 }
  0x2c   :  { %326 = vmatpush3.bf16.msra.mxu0 %v369_v1  ;;  %356 = vmatpush3.bf16.msra.mxu1 %v369_v1 }
  0x2d   :  { %327 = vmatprep.subr.bf16.mxu0 %v370_v2  ;;  %349 = vmatprep.subr.bf16.mxu1 %v370_v2  ;;  %p432_p6 = pnand %p431_p5, %p425_p2 }
  0x30   :  { %328 = vmatpush3.bf16.msra.mxu0 %v370_v2  ;;  %357 = vmatpush3.bf16.msra.mxu1 %v370_v2 }
  0x31   :  { %329 = vmatprep.subr.bf16.mxu0 %v371_v3  ;;  %350 = vmatprep.subr.bf16.mxu1 %v371_v3 }
  0x34   :  { %330 = vmatpush3.bf16.msra.mxu0 %v371_v3  ;;  %358 = vmatpush3.bf16.msra.mxu1 %v371_v3 }
  0x35   :  { %331 = vmatprep.subr.bf16.mxu0 %v372_v6  ;;  %351 = vmatprep.subr.bf16.mxu1 %v372_v6 }
  0x38   :  { %332 = vmatpush3.bf16.msra.mxu0 %v372_v6  ;;  %359 = vmatpush3.bf16.msra.mxu1 %v372_v6 }
  0x39   :  { %333 = vmatprep.subr.bf16.mxu0 %v373_v7  ;;  %352 = vmatprep.subr.bf16.mxu1 %v373_v7 }
  0x3c   :  { %334 = vmatpush3.bf16.msra.mxu0 %v373_v7  ;;  %360 = vmatpush3.bf16.msra.mxu1 %v373_v7 }
  0x3d   :  { %335 = vmatprep.subr.bf16.mxu0 %v374_v8  ;;  %353 = vmatprep.subr.bf16.mxu1 %v374_v8 }
  0x40   :  { %336 = vmatpush3.bf16.msra.mxu0 %v374_v8  ;;  %361 = vmatpush3.bf16.msra.mxu1 %v374_v8 }
  0x41   :  { %337 = vmatprep.subr.bf16.mxu0 %v375_v9  ;;  %354 = vmatprep.subr.bf16.mxu1 %v375_v9 }
  0x44   :  { %338 = vmatpush3.bf16.msra.mxu0 %v375_v9  ;;  %362 = vmatpush3.bf16.msra.mxu1 %v375_v9 }
  0x47   :  { %340 = vmatmul.mubr.bf16.vlgmr.msra.gmra.mrb[0].mxu0 %v378_v10  ;;  %344 = vmatmul.mubr.bf16.vlgmr.msra.gmra.mrb[0].mxu1 %v379_v11 }
 0x11a   :  { %v341_v12 = vpop.f32.mrb[0].mxu0  ;;  %v345_v13 = vpop.f32.mrb[0].mxu1 }
 0x11b   :  { %v171_v14 = vpop.f32.mrb[1].mxu0  ;;  %v187_v15 = vpop.f32.mrb[1].mxu1 }
 0x11c   :  { %v342_v16 = vpop.f32.mrb[2].mxu0  ;;  %v346_v17 = vpop.f32.mrb[2].mxu1 }
 0x11d   :  { %v296_v18 = vpack.c.bf16 %v342_v16, %v341_v12  ;;  %v306_v19 = vpack.c.bf16 %v346_v17, %v345_v13  ;;  %v174_v20 = vpop.f32.mrb[3].mxu0  ;;  %v190_v21 = vpop.f32.mrb[3].mxu1 }
 0x11e   :  { %v291_v22 = vpack.c.bf16 %v174_v20, %v171_v14  ;;  %v301_v23 = vpack.c.bf16 %v190_v21, %v187_v15 }
 0x11f   :  { %308 = vst [vmem:[#allocation7 + $0x8] sm:$0xff] %v296_v18   ;;  %310 = vst [vmem:[#allocation7 + $0x18] sm:$0xff] %v306_v19  }
 0x120   :  { %292 = vst [vmem:[#allocation7] sm:$0xff] %v291_v22   ;;  %309 = vst [vmem:[#allocation7 + $0x10] sm:$0xff] %v301_v23  }
 0x121   :  { %435 = shalt.err (!%p432_p6)
}
 0x122   :  { %s436_s10 = scalar_lea.hbm %s519_s2, 512 }
 0x123   :  { %p437_p7 = scmp.ne.s32.totalorder %s519_s2, %s436_s10  ;;  %p440_p8 = scmp.lt.u32.totalorder %s436_s10, %s519_s2 }
 0x125   :  { %p442_p9 = pnand %p440_p8, %p437_p7 }
 0x127   :  { %445 = shalt.err (!%p442_p9)
}
 0x128   :  { %253 = dma.vmem_to_hbm [thread:$0]  %s248_s6, 512, %s519_s2, [#allocation4], %s453_s19, %s453_s19, %s454_s20  }
 0x129   :  { %450 = dma.done.wait [#allocation4], 512  }
 0x12a   :  { %451 = vsyncadd [#allocation4], 4294966784 }
 0x12b   :  { %257 = vsyncpa [#allocation3], 1 }
 0x12c   :  { %258 = vsyncpa [#allocation6], 1 }
 0x12d   :  { %259 = vsyncpa [#allocation4], 1 }

</bundles_post_ra>
